<compile_context>
chip_gen: v6e
topology: v6e:2x2x1
jax: 0.10.0
libtpu: 0.0.40
codegen_flags: <defaults>
</compile_context>

<pallas_src>
import functools

import jax
import jax.numpy as jnp
from jax.experimental import pallas as pl
from jax.experimental.pallas import tpu as pltpu

_BN_EPS = 1e-5

# Row offsets of each (lane-padded) weight block inside the packed weight slab.
_W1_OFF, _W2_OFF, _W3_OFF, _W4_OFF, _W_END = 0, 288, 416, 544, 672
# Rows of the "vectors" slab: [g1, b1, g2, b2, g3, b3, g4, b4, w5_row, b5_row]
_V_ROWS = 10


def _mlp_kernel(x_ref, w_ref, v_ref, o_ref):
    def bn_relu(y, layer):
        # gamma / beta rows for this layer (lane-padded with zeros).
        g = v_ref[2 * layer : 2 * layer + 1, :]       # (1, 128)
        be = v_ref[2 * layer + 1 : 2 * layer + 2, :]  # (1, 128)
        # Two independent batch (sublane) reductions.
        mean = jnp.mean(y, axis=0, keepdims=True)
        mean_sq = jnp.mean(y * y, axis=0, keepdims=True)
        var = mean_sq - mean * mean                   # biased variance (PyTorch norm path)
        inv = jax.lax.rsqrt(var + _BN_EPS)            # EUP
        scale = g * inv                               # (1, 128) — tiny row math
        shift = be - mean * scale                     # (1, 128)
        return jnp.maximum(y * scale + shift, 0.0)    # one mul + one add on (B, 128)

    h = x_ref[...].astype(jnp.float32)                # (B, 288)

    y = jnp.dot(h, w_ref[_W1_OFF:_W2_OFF, :], preferred_element_type=jnp.float32)
    h = bn_relu(y, 0)                                 # (B, 128)
    y = jnp.dot(h, w_ref[_W2_OFF:_W3_OFF, :], preferred_element_type=jnp.float32)
    h = bn_relu(y, 1)                                 # (B, 128), lanes >=64 are zero
    y = jnp.dot(h, w_ref[_W3_OFF:_W4_OFF, :], preferred_element_type=jnp.float32)
    h = bn_relu(y, 2)                                 # lanes >=32 are zero
    y = jnp.dot(h, w_ref[_W4_OFF:_W_END, :], preferred_element_type=jnp.float32)
    h = bn_relu(y, 3)                                 # lanes >=16 are zero

    # Final (16 -> 1) layer: VPU multiply + lane reduce instead of an MXU matmul.
    w5_row = v_ref[8:9, :]                            # (1, 128), zeros beyond lane 15
    b5 = v_ref[9:10, 0:1]                             # (1, 1)
    logits = jnp.sum(h * w5_row, axis=-1, keepdims=True) + b5
    o_ref[...] = jax.nn.sigmoid(logits).astype(o_ref.dtype)


def pack_params(params):
    """Pack per-layer params into one weight slab and one vectors slab (f32)."""
    layers = params["layers"]

    # ---- Weight slab: (672, 128) ----
    w1 = layers[0][0]                                  # (288, 128) — already lane-full
    w_blocks = [w1.astype(jnp.float32)]
    for (w, _bias, _g, _be) in layers[1:4]:            # (128,64), (64,32), (32,16)
        d_in, d_out = w.shape
        wp = jnp.zeros((128, 128), jnp.float32).at[:d_in, :d_out].set(w)
        w_blocks.append(wp)
    w_packed = jnp.concatenate(w_blocks, axis=0)       # (672, 128)
    assert w_packed.shape == (_W_END, 128)

    # ---- Vectors slab: (10, 128) ----
    v_packed = jnp.zeros((_V_ROWS, 128), jnp.float32)
    r = 0
    for (_w, _bias, g, be) in layers[:4]:
        d = g.shape[0]
        v_packed = v_packed.at[r, :d].set(g)
        v_packed = v_packed.at[r + 1, :d].set(be)
        r += 2
    w5, b5 = layers[4]                                  # (16, 1), (1,)
    v_packed = v_packed.at[8, :16].set(w5[:, 0])
    v_packed = v_packed.at[9, 0].set(b5[0])
    return w_packed, v_packed


def disc_latent_forward(x, packed):
    """x: (B, C, H, W) NCHW (or already-flat (B, 288)). Returns (B, 1) sigmoid probs."""
    b = x.shape[0]
    x_flat = x.reshape(b, -1).astype(jnp.float32)
    assert x_flat.shape[1] == 288, f"expected 288 features, got {x_flat.shape[1]}"
    w_packed, v_packed = packed

    vmem = pl.BlockSpec(memory_space=pltpu.MemorySpace.VMEM)
    return pl.pallas_call(
        _mlp_kernel,
        out_shape=jax.ShapeDtypeStruct((b, 1), jnp.float32),
        in_specs=[vmem, vmem, vmem],
        out_specs=vmem,
    )(x_flat, w_packed, v_packed)


def init_params(key):
    """Deterministic synthetic parameters matching get_disc_latent.__init__ shapes.

    Dense biases for layers 1-4 are kept here (to mirror the PyTorch module's
    parameters) but are intentionally NOT used by the kernel: added before a
    train-mode BatchNorm they are cancelled exactly by the batch mean.
    """
    dims = [(288, 128), (128, 64), (64, 32), (32, 16), (16, 1)]
    layers = []
    for i, (d_in, d_out) in enumerate(dims):
        key, kw, kb = jax.random.split(key, 3)
        # Linear weight stored as (in, out): x @ W == PyTorch x @ W.T with W (out, in).
        scale = 1.0 / jnp.sqrt(jnp.float32(d_in))
        w = jax.random.uniform(kw, (d_in, d_out), jnp.float32, -scale, scale)
        bias = jax.random.uniform(kb, (d_out,), jnp.float32, -scale, scale)
        if i < len(dims) - 1:
            gamma = jnp.ones((d_out,), jnp.float32)   # PyTorch BN default init
            beta = jnp.zeros((d_out,), jnp.float32)
            layers.append((w, bias, gamma, beta))
        else:
            layers.append((w, bias))
    return {"layers": layers}


if __name__ == "__main__":
    key = jax.random.PRNGKey(0)
    key, k_x, k_p = jax.random.split(key, 3)

    # Input consistent with the 288-feature flatten: (B, 32, 3, 3), NCHW.
    x = jax.random.normal(k_x, (8, 32, 3, 3), dtype=jnp.float32)
    params = init_params(k_p)
    packed = pack_params(params)

    fwd = jax.jit(functools.partial(disc_latent_forward, packed=packed))
    out = fwd(x)
    jax.block_until_ready(out)

    assert out.shape == (8, 1)
    assert bool(jnp.all((out >= 0.0) & (out <= 1.0)))
    assert bool(jnp.all(jnp.isfinite(out)))
    print("KERNEL_OK")
</pallas_src>

<mosaic_0001>
module attributes {stable_mosaic.version = 11 : i64} {
  func.func @_mlp_kernel(%arg0: memref<8x288xf32, #tpu.memory_space<vmem>>, %arg1: memref<672x128xf32, #tpu.memory_space<vmem>>, %arg2: memref<10x128xf32, #tpu.memory_space<vmem>>, %arg3: memref<8x1xf32, #tpu.memory_space<vmem>>) attributes {dimension_semantics = [], scalar_prefetch = 0 : i64, scratch_operands = 0 : i64, tpu.core_type = #tpu.core_type<tc>} {
    %c0 = arith.constant 0 : index
    %c0_0 = arith.constant 0 : index
    %0 = vector.load %arg0[%c0, %c0_0] : memref<8x288xf32, #tpu.memory_space<vmem>>, vector<8x288xf32>
    %c0_1 = arith.constant 0 : index
    %c0_2 = arith.constant 0 : index
    %1 = vector.load %arg1[%c0_1, %c0_2] : memref<672x128xf32, #tpu.memory_space<vmem>>, vector<288x128xf32>
    %cst = arith.constant dense<0.000000e+00> : vector<8x128xf32>
    %2 = tpu.matmul %0, %1, %cst {dimension_numbers = #tpu.dot_dimension_numbers<[1], [0], [0], [1], [0, 0, 1, 1], [], []>} : vector<8x288xf32>, vector<288x128xf32>, vector<8x128xf32> -> vector<8x128xf32>
    %c0_3 = arith.constant 0 : index
    %c0_4 = arith.constant 0 : index
    %3 = vector.load %arg2[%c0_3, %c0_4] : memref<10x128xf32, #tpu.memory_space<vmem>>, vector<1x128xf32>
    %c1 = arith.constant 1 : index
    %c0_5 = arith.constant 0 : index
    %4 = vector.load %arg2[%c1, %c0_5] : memref<10x128xf32, #tpu.memory_space<vmem>>, vector<1x128xf32>
    %cst_6 = arith.constant dense<0.000000e+00> : vector<128xf32>
    %5 = vector.multi_reduction <add>, %2, %cst_6 [0] : vector<8x128xf32> to vector<128xf32>
    %6 = vector.shape_cast %5 : vector<128xf32> to vector<1x128xf32>
    %cst_7 = arith.constant 8.000000e+00 : f32
    %7 = vector.broadcast %cst_7 : f32 to vector<1x128xf32>
    %8 = arith.divf %6, %7 : vector<1x128xf32>
    %9 = arith.mulf %2, %2 : vector<8x128xf32>
    %cst_8 = arith.constant dense<0.000000e+00> : vector<128xf32>
    %10 = vector.multi_reduction <add>, %9, %cst_8 [0] : vector<8x128xf32> to vector<128xf32>
    %11 = vector.shape_cast %10 : vector<128xf32> to vector<1x128xf32>
    %cst_9 = arith.constant 8.000000e+00 : f32
    %12 = vector.broadcast %cst_9 : f32 to vector<1x128xf32>
    %13 = arith.divf %11, %12 : vector<1x128xf32>
    %14 = arith.mulf %8, %8 : vector<1x128xf32>
    %15 = arith.subf %13, %14 : vector<1x128xf32>
    %cst_10 = arith.constant 9.99999974E-6 : f32
    %16 = vector.broadcast %cst_10 : f32 to vector<1x128xf32>
    %17 = arith.addf %15, %16 : vector<1x128xf32>
    %18 = math.rsqrt %17 : vector<1x128xf32>
    %19 = arith.mulf %3, %18 : vector<1x128xf32>
    %20 = arith.mulf %8, %19 : vector<1x128xf32>
    %21 = arith.subf %4, %20 : vector<1x128xf32>
    %22 = vector.broadcast %19 : vector<1x128xf32> to vector<8x128xf32>
    %23 = arith.mulf %2, %22 : vector<8x128xf32>
    %24 = vector.broadcast %21 : vector<1x128xf32> to vector<8x128xf32>
    %25 = arith.addf %23, %24 : vector<8x128xf32>
    %cst_11 = arith.constant 0.000000e+00 : f32
    %26 = vector.broadcast %cst_11 : f32 to vector<8x128xf32>
    %27 = arith.maximumf %25, %26 : vector<8x128xf32>
    %c288 = arith.constant 288 : index
    %c0_12 = arith.constant 0 : index
    %28 = vector.load %arg1[%c288, %c0_12] : memref<672x128xf32, #tpu.memory_space<vmem>>, vector<128x128xf32>
    %cst_13 = arith.constant dense<0.000000e+00> : vector<8x128xf32>
    %29 = tpu.matmul %27, %28, %cst_13 {dimension_numbers = #tpu.dot_dimension_numbers<[1], [0], [0], [1], [0, 0, 1, 1], [], []>} : vector<8x128xf32>, vector<128x128xf32>, vector<8x128xf32> -> vector<8x128xf32>
    %c2 = arith.constant 2 : index
    %c0_14 = arith.constant 0 : index
    %30 = vector.load %arg2[%c2, %c0_14] : memref<10x128xf32, #tpu.memory_space<vmem>>, vector<1x128xf32>
    %c3 = arith.constant 3 : index
    %c0_15 = arith.constant 0 : index
    %31 = vector.load %arg2[%c3, %c0_15] : memref<10x128xf32, #tpu.memory_space<vmem>>, vector<1x128xf32>
    %cst_16 = arith.constant dense<0.000000e+00> : vector<128xf32>
    %32 = vector.multi_reduction <add>, %29, %cst_16 [0] : vector<8x128xf32> to vector<128xf32>
    %33 = vector.shape_cast %32 : vector<128xf32> to vector<1x128xf32>
    %cst_17 = arith.constant 8.000000e+00 : f32
    %34 = vector.broadcast %cst_17 : f32 to vector<1x128xf32>
    %35 = arith.divf %33, %34 : vector<1x128xf32>
    %36 = arith.mulf %29, %29 : vector<8x128xf32>
    %cst_18 = arith.constant dense<0.000000e+00> : vector<128xf32>
    %37 = vector.multi_reduction <add>, %36, %cst_18 [0] : vector<8x128xf32> to vector<128xf32>
    %38 = vector.shape_cast %37 : vector<128xf32> to vector<1x128xf32>
    %cst_19 = arith.constant 8.000000e+00 : f32
    %39 = vector.broadcast %cst_19 : f32 to vector<1x128xf32>
    %40 = arith.divf %38, %39 : vector<1x128xf32>
    %41 = arith.mulf %35, %35 : vector<1x128xf32>
    %42 = arith.subf %40, %41 : vector<1x128xf32>
    %cst_20 = arith.constant 9.99999974E-6 : f32
    %43 = vector.broadcast %cst_20 : f32 to vector<1x128xf32>
    %44 = arith.addf %42, %43 : vector<1x128xf32>
    %45 = math.rsqrt %44 : vector<1x128xf32>
    %46 = arith.mulf %30, %45 : vector<1x128xf32>
    %47 = arith.mulf %35, %46 : vector<1x128xf32>
    %48 = arith.subf %31, %47 : vector<1x128xf32>
    %49 = vector.broadcast %46 : vector<1x128xf32> to vector<8x128xf32>
    %50 = arith.mulf %29, %49 : vector<8x128xf32>
    %51 = vector.broadcast %48 : vector<1x128xf32> to vector<8x128xf32>
    %52 = arith.addf %50, %51 : vector<8x128xf32>
    %cst_21 = arith.constant 0.000000e+00 : f32
    %53 = vector.broadcast %cst_21 : f32 to vector<8x128xf32>
    %54 = arith.maximumf %52, %53 : vector<8x128xf32>
    %c416 = arith.constant 416 : index
    %c0_22 = arith.constant 0 : index
    %55 = vector.load %arg1[%c416, %c0_22] : memref<672x128xf32, #tpu.memory_space<vmem>>, vector<128x128xf32>
    %cst_23 = arith.constant dense<0.000000e+00> : vector<8x128xf32>
    %56 = tpu.matmul %54, %55, %cst_23 {dimension_numbers = #tpu.dot_dimension_numbers<[1], [0], [0], [1], [0, 0, 1, 1], [], []>} : vector<8x128xf32>, vector<128x128xf32>, vector<8x128xf32> -> vector<8x128xf32>
    %c4 = arith.constant 4 : index
    %c0_24 = arith.constant 0 : index
    %57 = vector.load %arg2[%c4, %c0_24] : memref<10x128xf32, #tpu.memory_space<vmem>>, vector<1x128xf32>
    %c5 = arith.constant 5 : index
    %c0_25 = arith.constant 0 : index
    %58 = vector.load %arg2[%c5, %c0_25] : memref<10x128xf32, #tpu.memory_space<vmem>>, vector<1x128xf32>
    %cst_26 = arith.constant dense<0.000000e+00> : vector<128xf32>
    %59 = vector.multi_reduction <add>, %56, %cst_26 [0] : vector<8x128xf32> to vector<128xf32>
    %60 = vector.shape_cast %59 : vector<128xf32> to vector<1x128xf32>
    %cst_27 = arith.constant 8.000000e+00 : f32
    %61 = vector.broadcast %cst_27 : f32 to vector<1x128xf32>
    %62 = arith.divf %60, %61 : vector<1x128xf32>
    %63 = arith.mulf %56, %56 : vector<8x128xf32>
    %cst_28 = arith.constant dense<0.000000e+00> : vector<128xf32>
    %64 = vector.multi_reduction <add>, %63, %cst_28 [0] : vector<8x128xf32> to vector<128xf32>
    %65 = vector.shape_cast %64 : vector<128xf32> to vector<1x128xf32>
    %cst_29 = arith.constant 8.000000e+00 : f32
    %66 = vector.broadcast %cst_29 : f32 to vector<1x128xf32>
    %67 = arith.divf %65, %66 : vector<1x128xf32>
    %68 = arith.mulf %62, %62 : vector<1x128xf32>
    %69 = arith.subf %67, %68 : vector<1x128xf32>
    %cst_30 = arith.constant 9.99999974E-6 : f32
    %70 = vector.broadcast %cst_30 : f32 to vector<1x128xf32>
    %71 = arith.addf %69, %70 : vector<1x128xf32>
    %72 = math.rsqrt %71 : vector<1x128xf32>
    %73 = arith.mulf %57, %72 : vector<1x128xf32>
    %74 = arith.mulf %62, %73 : vector<1x128xf32>
    %75 = arith.subf %58, %74 : vector<1x128xf32>
    %76 = vector.broadcast %73 : vector<1x128xf32> to vector<8x128xf32>
    %77 = arith.mulf %56, %76 : vector<8x128xf32>
    %78 = vector.broadcast %75 : vector<1x128xf32> to vector<8x128xf32>
    %79 = arith.addf %77, %78 : vector<8x128xf32>
    %cst_31 = arith.constant 0.000000e+00 : f32
    %80 = vector.broadcast %cst_31 : f32 to vector<8x128xf32>
    %81 = arith.maximumf %79, %80 : vector<8x128xf32>
    %c544 = arith.constant 544 : index
    %c0_32 = arith.constant 0 : index
    %82 = vector.load %arg1[%c544, %c0_32] : memref<672x128xf32, #tpu.memory_space<vmem>>, vector<128x128xf32>
    %cst_33 = arith.constant dense<0.000000e+00> : vector<8x128xf32>
    %83 = tpu.matmul %81, %82, %cst_33 {dimension_numbers = #tpu.dot_dimension_numbers<[1], [0], [0], [1], [0, 0, 1, 1], [], []>} : vector<8x128xf32>, vector<128x128xf32>, vector<8x128xf32> -> vector<8x128xf32>
    %c6 = arith.constant 6 : index
    %c0_34 = arith.constant 0 : index
    %84 = vector.load %arg2[%c6, %c0_34] : memref<10x128xf32, #tpu.memory_space<vmem>>, vector<1x128xf32>
    %c7 = arith.constant 7 : index
    %c0_35 = arith.constant 0 : index
    %85 = vector.load %arg2[%c7, %c0_35] : memref<10x128xf32, #tpu.memory_space<vmem>>, vector<1x128xf32>
    %cst_36 = arith.constant dense<0.000000e+00> : vector<128xf32>
    %86 = vector.multi_reduction <add>, %83, %cst_36 [0] : vector<8x128xf32> to vector<128xf32>
    %87 = vector.shape_cast %86 : vector<128xf32> to vector<1x128xf32>
    %cst_37 = arith.constant 8.000000e+00 : f32
    %88 = vector.broadcast %cst_37 : f32 to vector<1x128xf32>
    %89 = arith.divf %87, %88 : vector<1x128xf32>
    %90 = arith.mulf %83, %83 : vector<8x128xf32>
    %cst_38 = arith.constant dense<0.000000e+00> : vector<128xf32>
    %91 = vector.multi_reduction <add>, %90, %cst_38 [0] : vector<8x128xf32> to vector<128xf32>
    %92 = vector.shape_cast %91 : vector<128xf32> to vector<1x128xf32>
    %cst_39 = arith.constant 8.000000e+00 : f32
    %93 = vector.broadcast %cst_39 : f32 to vector<1x128xf32>
    %94 = arith.divf %92, %93 : vector<1x128xf32>
    %95 = arith.mulf %89, %89 : vector<1x128xf32>
    %96 = arith.subf %94, %95 : vector<1x128xf32>
    %cst_40 = arith.constant 9.99999974E-6 : f32
    %97 = vector.broadcast %cst_40 : f32 to vector<1x128xf32>
    %98 = arith.addf %96, %97 : vector<1x128xf32>
    %99 = math.rsqrt %98 : vector<1x128xf32>
    %100 = arith.mulf %84, %99 : vector<1x128xf32>
    %101 = arith.mulf %89, %100 : vector<1x128xf32>
    %102 = arith.subf %85, %101 : vector<1x128xf32>
    %103 = vector.broadcast %100 : vector<1x128xf32> to vector<8x128xf32>
    %104 = arith.mulf %83, %103 : vector<8x128xf32>
    %105 = vector.broadcast %102 : vector<1x128xf32> to vector<8x128xf32>
    %106 = arith.addf %104, %105 : vector<8x128xf32>
    %cst_41 = arith.constant 0.000000e+00 : f32
    %107 = vector.broadcast %cst_41 : f32 to vector<8x128xf32>
    %108 = arith.maximumf %106, %107 : vector<8x128xf32>
    %c8 = arith.constant 8 : index
    %c0_42 = arith.constant 0 : index
    %109 = vector.load %arg2[%c8, %c0_42] : memref<10x128xf32, #tpu.memory_space<vmem>>, vector<1x128xf32>
    %c9 = arith.constant 9 : index
    %c0_43 = arith.constant 0 : index
    %110 = vector.load %arg2[%c9, %c0_43] : memref<10x128xf32, #tpu.memory_space<vmem>>, vector<1x1xf32>
    %111 = vector.broadcast %109 : vector<1x128xf32> to vector<8x128xf32>
    %112 = arith.mulf %108, %111 : vector<8x128xf32>
    %cst_44 = arith.constant dense<0.000000e+00> : vector<8xf32>
    %113 = vector.multi_reduction <add>, %112, %cst_44 [1] : vector<8x128xf32> to vector<8xf32>
    %114 = vector.shape_cast %113 : vector<8xf32> to vector<8x1xf32>
    %115 = vector.broadcast %110 : vector<1x1xf32> to vector<8x1xf32>
    %116 = arith.addf %114, %115 : vector<8x1xf32>
    %117 = arith.negf %116 : vector<8x1xf32>
    %118 = math.exp %117 : vector<8x1xf32>
    %cst_45 = arith.constant 1.000000e+00 : f32
    %119 = vector.broadcast %cst_45 : f32 to vector<8x1xf32>
    %120 = arith.addf %119, %118 : vector<8x1xf32>
    %121 = arith.divf %119, %120 : vector<8x1xf32>
    %c0_46 = arith.constant 0 : index
    %c0_47 = arith.constant 0 : index
    %122 = vector.load %arg3[%c0_46, %c0_47] : memref<8x1xf32, #tpu.memory_space<vmem>>, vector<8x1xf32>
    tpu.vector_store %arg3[%c0_46, %c0_47], %121 {strides = array<i32>} : memref<8x1xf32, #tpu.memory_space<vmem>>, vector<8x1xf32>,
    return
  }
}

</mosaic_0001>

<bundles_post_ra>
// kernel: disc_latent_forward.1
= control target key start
LH: loop header
LB: loop body
LE: loop exit
PB: predicated region body
PF: predicated region fallthrough
CT: control target
= control target key end

     0   :  { %v847_v3 = vmov 0.0   ;;  %vm848_vm0 = vmmov 0   ;;  %vm53_vm1 = vcmask 261120   ;;  %vm616_vm2 = vcmask 7168   ;;  %s1233_s1 = inlined_call_operand.vmem [shape: f32[672,128], index: 1, kind: input, shape index: {}]   ;;  %s1234_s0 = inlined_call_operand.vmem [shape: f32[8,288], index: 0, kind: input, shape index: {}]   ;;  %s1235_s2 = inlined_call_operand.vmem [shape: f32[10,128], index: 2, kind: input, shape index: {}]   ;;  %s1236_s3 = inlined_call_operand.vmem [shape: f32[8,1], index: 3, kind: output, shape index: {}]  }
   0x1   :  { %v48_v0 = vld [vmem:[%s1233_s1 + $0xf8] sm:$0xff]  ;;  %v47_v2 = vld [vmem:[%s1233_s1 + $0xf0] sm:$0xff]  ;;  %717 = vmatprep.subr.mxu1 %v847_v3  ;;  %725 = vmatprep.mubr.msk.f32.mxu1 %vm848_vm0, %v847_v3  ;;  %v46_v5 = vld [vmem:[%s1233_s1 + $0xe8] sm:$0xff] }
   0x2   :  { %v32_v1 = vld [vmem:[%s1233_s1 + $0x78] sm:$0xff]  ;;  %626 = vmatprep.subr.mxu0 %v48_v0  ;;  %v31_v4 = vld [vmem:[%s1233_s1 + $0x70] sm:$0xff]  ;;  %v30_v6 = vld [vmem:[%s1233_s1 + $0x68] sm:$0xff] }
   0x3   :  { %627 = vmatpush3.msra.mxu0 %v32_v1  ;;  %v45_v7 = vld [vmem:[%s1233_s1 + $0xe0] sm:$0xff]  ;;  %v44_v9 = vld [vmem:[%s1233_s1 + $0xd8] sm:$0xff]  ;;  %v43_v11 = vld [vmem:[%s1233_s1 + $0xd0] sm:$0xff] }
   0x4   :  { %628 = vmatprep.subr.mxu0 %v47_v2  ;;  %v29_v8 = vld [vmem:[%s1233_s1 + $0x60] sm:$0xff]  ;;  %v28_v10 = vld [vmem:[%s1233_s1 + $0x58] sm:$0xff]  ;;  %v27_v12 = vld [vmem:[%s1233_s1 + $0x50] sm:$0xff] }
   0x5   :  { %629 = vmatpush3.msra.mxu0 %v31_v4  ;;  %v52_v13 = vld [vmem:[%s1233_s1 + $0x118] sm:$0xff]  ;;  %v42_v14 = vld [vmem:[%s1233_s1 + $0xc8] sm:$0xff]  ;;  %v51_v15 = vld [vmem:[%s1233_s1 + $0x110] sm:$0xff] }
   0x6   :  { %630 = vmatprep.subr.mxu0 %v46_v5  ;;  %718 = vmatpush3.msra.mxu1 %v52_v13  ;;  %v26_v16 = vld [vmem:[%s1233_s1 + $0x48] sm:$0xff]  ;;  %v41_v18 = vld [vmem:[%s1233_s1 + $0xc0] sm:$0xff]  ;;  %v40_v21 = vld [vmem:[%s1233_s1 + $0xb8] sm:$0xff] }
   0x7   :  { %631 = vmatpush3.msra.mxu0 %v30_v6  ;;  %719 = vmatprep.subr.mxu1 %v847_v3  ;;  %v15_v17 = vld [vmem:[%s1234_s0 + $0x8] sm:$0xff]  ;;  %v25_v20 = vld [vmem:[%s1233_s1 + $0x40] sm:$0xff]  ;;  %v24_v23 = vld [vmem:[%s1233_s1 + $0x38] sm:$0xff] }
   0x8   :  { %632 = vmatprep.subr.mxu0 %v45_v7  ;;  %720 = vmatpush3.msra.mxu1 %v51_v15  ;;  %v50_v19 = vld [vmem:[%s1233_s1 + $0x108] sm:$0xff]  ;;  %v49_v22 = vld [vmem:[%s1233_s1 + $0x100] sm:$0xff]  ;;  %v16_v24 = vld [vmem:[%s1234_s0 + $0x10] sm:$0xff] }
   0x9   :  { %633 = vmatpush3.msra.mxu0 %v29_v8  ;;  %721 = vmatprep.subr.mxu1 %v847_v3  ;;  %v39_v25 = vld [vmem:[%s1233_s1 + $0xb0] sm:$0xff]  ;;  %v38_v27 = vld [vmem:[%s1233_s1 + $0xa8] sm:$0xff]  ;;  %v37_v29 = vld [vmem:[%s1233_s1 + $0xa0] sm:$0xff] }
   0xa   :  { %634 = vmatprep.subr.mxu0 %v44_v9  ;;  %121 = vmatprep.mubr.f32.mxu0 %v15_v17  ;;  %v23_v26 = vld [vmem:[%s1233_s1 + $0x30] sm:$0xff]  ;;  %v22_v28 = vld [vmem:[%s1233_s1 + $0x28] sm:$0xff]  ;;  %v21_v30 = vld [vmem:[%s1233_s1 + $0x20] sm:$0xff]  ;;  %v222_v17 = vlaneseq }
   0xb   :  { %635 = vmatpush3.msra.mxu0 %v28_v10  ;;  %722 = vmatpush3.msra.mxu1 %v50_v19  ;;  %v36_v31 = vld [vmem:[%s1233_s1 + $0x98] sm:$0xff]  ;;  %v35_v33 = vld [vmem:[%s1233_s1 + $0x90] sm:$0xff]  ;;  %v34_v35 = vld [vmem:[%s1233_s1 + $0x88] sm:$0xff] }
   0xc   :  { %636 = vmatprep.subr.mxu0 %v43_v11  ;;  %723 = vmatprep.subr.mxu1 %v847_v3  ;;  %v20_v32 = vld [vmem:[%s1233_s1 + $0x18] sm:$0xff]  ;;  %v19_v34 = vld [vmem:[%s1233_s1 + $0x10] sm:$0xff]  ;;  %v18_v36 = vld [vmem:[%s1233_s1 + $0x8] sm:$0xff] }
   0xd   :  { %637 = vmatpush3.msra.mxu0 %v27_v12  ;;  %724 = vmatpush3.msra.mxu1 %v49_v22  ;;  %v33_v37 = vld [vmem:[%s1233_s1 + $0x80] sm:$0xff]  ;;  %v248_v40 = vld [vmem:[%s1233_s1 + $0x198] sm:$0xff]  ;;  %v247_v41 = vld [vmem:[%s1233_s1 + $0x190] sm:$0xff] }
   0xe   :  { %638 = vmatprep.subr.mxu0 %v42_v14  ;;  %726 = vmatmul.mubr.msk.f32.vlgmr.msra.gmra.mxu1 %vm53_vm1, %v16_v24  ;;  %v17_v38 = vld [vmem:[%s1233_s1] sm:$0xff]  ;;  %v246_v42 = vld [vmem:[%s1233_s1 + $0x188] sm:$0xff]  ;;  %v244_v44 = vld [vmem:[%s1233_s1 + $0x178] sm:$0xff] }
   0xf   :  { %639 = vmatpush3.msra.mxu0 %v26_v16  ;;  %728 = vmatprep.subr.mxu1 %v847_v3  ;;  %v14_v39 = vld [vmem:[%s1234_s0] sm:$0xff]  ;;  %v243_v45 = vld [vmem:[%s1233_s1 + $0x170] sm:$0xff]  ;;  %v242_v46 = vld [vmem:[%s1233_s1 + $0x168] sm:$0xff] }
  0x10   :  { %640 = vmatprep.subr.mxu0 %v41_v18  ;;  %760 = vmatprep.mubr.msk.f32.mxu1 %vm848_vm0, %v847_v3  ;;  %v245_v43 = vld [vmem:[%s1233_s1 + $0x180] sm:$0xff]  ;;  %v240_v48 = vld [vmem:[%s1233_s1 + $0x158] sm:$0xff]  ;;  %v239_v49 = vld [vmem:[%s1233_s1 + $0x150] sm:$0xff]  ;;  %v223_v18 = vshrl.u32 %v222_v17, 7 }
  0x11   :  { %641 = vmatpush3.msra.mxu0 %v25_v20  ;;  %729 = vmatpush3.msra.mxu1 %v248_v40  ;;  %v241_v47 = vld [vmem:[%s1233_s1 + $0x160] sm:$0xff]  ;;  %v238_v50 = vld [vmem:[%s1233_s1 + $0x148] sm:$0xff]  ;;  %v236_v52 = vld [vmem:[%s1233_s1 + $0x138] sm:$0xff] }
  0x12   :  { %642 = vmatprep.subr.mxu0 %v40_v21  ;;  %730 = vmatprep.subr.mxu1 %v847_v3  ;;  %v237_v51 = vld [vmem:[%s1233_s1 + $0x140] sm:$0xff]  ;;  %v235_v53 = vld [vmem:[%s1233_s1 + $0x130] sm:$0xff]  ;;  %v234_v54 = vld [vmem:[%s1233_s1 + $0x128] sm:$0xff]  ;;  %v1065_v20 = vsub.s32 0, %v223_v18 }
  0x13   :  { %643 = vmatpush3.msra.mxu0 %v24_v23  ;;  %731 = vmatpush3.msra.mxu1 %v247_v41  ;;  %v233_v55 = vld [vmem:[%s1233_s1 + $0x120] sm:$0xff]  ;;  %v360_v40 = vld [vmem:[%s1233_s1 + $0x1d0] sm:$0xff]  ;;  %v359_v41 = vld [vmem:[%s1233_s1 + $0x1c8] sm:$0xff] }
  0x14   :  { %644 = vmatprep.subr.mxu0 %v39_v25  ;;  %732 = vmatprep.subr.mxu1 %v847_v3  ;;  %v197_v19 = vld [vmem:[%s1235_s2] sm:$0x1]  ;;  %v198_v23 = vld [vmem:[%s1235_s2 + $0x1] sm:$0x1]  ;;  %v488_v17 = vld [vmem:[%s1233_s1 + $0x288] sm:$0xff] }
  0x15   :  { %645 = vmatpush3.msra.mxu0 %v23_v26  ;;  %733 = vmatpush3.msra.mxu1 %v246_v42  ;;  %v358_v42 = vld [vmem:[%s1233_s1 + $0x1c0] sm:$0xff] }
  0x16   :  { %646 = vmatprep.subr.mxu0 %v38_v27  ;;  %734 = vmatprep.subr.mxu1 %v847_v3  ;;  %v487_v18 = vld [vmem:[%s1233_s1 + $0x280] sm:$0xff] }
  0x17   :  { %647 = vmatpush3.msra.mxu0 %v22_v28  ;;  %735 = vmatpush3.msra.mxu1 %v245_v43  ;;  %v357_v43 = vld [vmem:[%s1233_s1 + $0x1b8] sm:$0xff] }
  0x18   :  { %648 = vmatprep.subr.mxu0 %v37_v29  ;;  %736 = vmatprep.subr.mxu1 %v847_v3 }
  0x19   :  { %649 = vmatpush3.msra.mxu0 %v21_v30  ;;  %737 = vmatpush3.msra.mxu1 %v244_v44  ;;  %v356_v44 = vld [vmem:[%s1233_s1 + $0x1b0] sm:$0xff] }
  0x1a   :  { %650 = vmatprep.subr.mxu0 %v36_v31  ;;  %738 = vmatprep.subr.mxu1 %v847_v3  ;;  %v369_v31 = vld [vmem:[%s1233_s1 + $0x218] sm:$0xff] }
  0x1b   :  { %651 = vmatpush3.msra.mxu0 %v20_v32  ;;  %739 = vmatpush3.msra.mxu1 %v243_v45  ;;  %v368_v32 = vld [vmem:[%s1233_s1 + $0x210] sm:$0xff]  ;;  %v355_v45 = vld [vmem:[%s1233_s1 + $0x1a8] sm:$0xff] }
  0x1c   :  { %652 = vmatprep.subr.mxu0 %v35_v33  ;;  %740 = vmatprep.subr.mxu1 %v847_v3  ;;  %v367_v33 = vld [vmem:[%s1233_s1 + $0x208] sm:$0xff] }
  0x1d   :  { %653 = vmatpush3.msra.mxu0 %v19_v34  ;;  %741 = vmatpush3.msra.mxu1 %v242_v46  ;;  %v366_v34 = vld [vmem:[%s1233_s1 + $0x200] sm:$0xff] }
  0x1e   :  { %654 = vmatprep.subr.mxu0 %v34_v35  ;;  %742 = vmatprep.subr.mxu1 %v847_v3  ;;  %v365_v35 = vld [vmem:[%s1233_s1 + $0x1f8] sm:$0xff]  ;;  %v354_v46 = vld [vmem:[%s1233_s1 + $0x1a0] sm:$0xff] }
  0x1f   :  { %655 = vmatpush3.msra.mxu0 %v18_v36  ;;  %743 = vmatpush3.msra.mxu1 %v241_v47  ;;  %v364_v36 = vld [vmem:[%s1233_s1 + $0x1f0] sm:$0xff] }
  0x20   :  { %656 = vmatprep.subr.mxu0 %v33_v37  ;;  %744 = vmatprep.subr.mxu1 %v847_v3  ;;  %v363_v37 = vld [vmem:[%s1233_s1 + $0x1e8] sm:$0xff] }
  0x21   :  { %657 = vmatpush3.msra.mxu0 %v17_v38  ;;  %745 = vmatpush3.msra.mxu1 %v240_v48  ;;  %v362_v38 = vld [vmem:[%s1233_s1 + $0x1e0] sm:$0xff] }
  0x22   :  { %122 = vmatmul.mubr.f32.vlgmr.msra.gmra.mxu0 %v14_v39  ;;  %763 = vmatprep.subr.mxu0 %v847_v3  ;;  %v361_v39 = vld [vmem:[%s1233_s1 + $0x1d8] sm:$0xff] }
  0x23   :  { %795 = vmatprep.mubr.msk.f32.mxu0 %vm848_vm0, %v847_v3  ;;  %746 = vmatprep.subr.mxu1 %v847_v3 }
  0x24   :  { %747 = vmatpush3.msra.mxu1 %v239_v49  ;;  %764 = vmatpush3.msra.mxu0 %v369_v31  ;;  %v475_v31 = vld [vmem:[%s1233_s1 + $0x220] sm:$0xff] }
  0x25   :  { %748 = vmatprep.subr.mxu1 %v847_v3  ;;  %765 = vmatprep.subr.mxu0 %v847_v3 }
  0x26   :  { %749 = vmatpush3.msra.mxu1 %v238_v50  ;;  %766 = vmatpush3.msra.mxu0 %v368_v32 }
  0x27   :  { %750 = vmatprep.subr.mxu1 %v847_v3  ;;  %767 = vmatprep.subr.mxu0 %v847_v3 }
  0x28   :  { %751 = vmatpush3.msra.mxu1 %v237_v51  ;;  %768 = vmatpush3.msra.mxu0 %v367_v33 }
  0x29   :  { %752 = vmatprep.subr.mxu1 %v847_v3  ;;  %769 = vmatprep.subr.mxu0 %v847_v3 }
  0x2a   :  { %753 = vmatpush3.msra.mxu1 %v236_v52  ;;  %770 = vmatpush3.msra.mxu0 %v366_v34 }
  0x2b   :  { %754 = vmatprep.subr.mxu1 %v847_v3  ;;  %771 = vmatprep.subr.mxu0 %v847_v3 }
  0x2c   :  { %755 = vmatpush3.msra.mxu1 %v235_v53  ;;  %772 = vmatpush3.msra.mxu0 %v365_v35 }
  0x2d   :  { %756 = vmatprep.subr.mxu1 %v847_v3  ;;  %773 = vmatprep.subr.mxu0 %v847_v3 }
  0x2e   :  { %757 = vmatpush3.msra.mxu1 %v234_v54  ;;  %774 = vmatpush3.msra.mxu0 %v364_v36 }
  0x2f   :  { %758 = vmatprep.subr.mxu1 %v847_v3  ;;  %775 = vmatprep.subr.mxu0 %v847_v3 }
  0x30   :  { %759 = vmatpush3.msra.mxu1 %v233_v55  ;;  %776 = vmatpush3.msra.mxu0 %v363_v37 }
  0x31   :  { %798 = vmatprep.subr.mxu1 %v847_v3  ;;  %777 = vmatprep.subr.mxu0 %v847_v3 }
  0x32   :  { %778 = vmatpush3.msra.mxu0 %v362_v38 }
  0x33   :  { %779 = vmatprep.subr.mxu0 %v847_v3 }
  0x34   :  { %780 = vmatpush3.msra.mxu0 %v361_v39 }
  0x35   :  { %781 = vmatprep.subr.mxu0 %v847_v3 }
  0x36   :  { %782 = vmatpush3.msra.mxu0 %v360_v40 }
  0x37   :  { %783 = vmatprep.subr.mxu0 %v847_v3 }
  0x38   :  { %784 = vmatpush3.msra.mxu0 %v359_v41 }
  0x39   :  { %785 = vmatprep.subr.mxu0 %v847_v3 }
  0x3a   :  { %786 = vmatpush3.msra.mxu0 %v358_v42 }
  0x3b   :  { %787 = vmatprep.subr.mxu0 %v847_v3 }
  0x3c   :  { %788 = vmatpush3.msra.mxu0 %v357_v43 }
  0x3d   :  { %789 = vmatprep.subr.mxu0 %v847_v3 }
  0x3e   :  { %790 = vmatpush3.msra.mxu0 %v356_v44 }
  0x3f   :  { %791 = vmatprep.subr.mxu0 %v847_v3 }
  0x40   :  { %792 = vmatpush3.msra.mxu0 %v355_v45 }
  0x41   :  { %793 = vmatprep.subr.mxu0 %v847_v3 }
  0x42   :  { %794 = vmatpush3.msra.mxu0 %v354_v46 }
  0xce   :  { %v193_v56 = vpop.f32.mrf.mxu1 }
  0xd0   :  { %v727_v57 = vpop.f32.mrf.mxu1 }
  0xe2   :  { %v658_v58 = vpop.f32.mrf.mxu0 }
  0xe4   :  { %v659_v59 = vpop.f32.mrf.mxu0 }
  0xe5   :  { %v660_v60 = vadd.f32 %v659_v59, %v658_v58 }
  0xe7   :  { %v194_v61 = vadd.f32 %v660_v60, %v193_v56 }
  0xe9   :  { %v199_v62 = vrot.slane %v194_v61, 4  ;;  %v207_v63 = vmul.f32 %v194_v61, %v194_v61 }
  0xeb   :  { %v200_v0 = vadd.f32 %v199_v62, %v194_v61  ;;  %v208_v1 = vrot.slane %v207_v63, 4 }
  0xed   :  { %v201_v2 = vrot.slane %v200_v0, 2  ;;  %v209_v4 = vadd.f32 %v208_v1, %v207_v63 }
  0xef   :  { %v202_v5 = vadd.f32 %v201_v2, %v200_v0  ;;  %v210_v6 = vrot.slane %v209_v4, 2 }
  0xf1   :  { %v203_v7 = vrot.slane %v202_v5, 1  ;;  %v211_v8 = vadd.f32 %v210_v6, %v209_v4  ;;  %v319_v4 = vld [vmem:[%s1235_s2 + $0x2] sm:$0x1] }
  0xf3   :  { %v204_v9 = vadd.f32 %v203_v7, %v202_v5  ;;  %v212_v10 = vrot.slane %v211_v8, 1  ;;  %v320_v7 = vld [vmem:[%s1235_s2 + $0x3] sm:$0x1] }
  0xf5   :  { %v206_v11 = vmul.f32 0.125, %v204_v9  ;;  %v213_v12 = vadd.f32 %v212_v10, %v211_v8 }
  0xf7   :  { %v214_v13 = vmul.f32 0.125, %v213_v12  ;;  %v215_v14 = vmul.f32 %v206_v11, %v206_v11 }
  0xf9   :  { %v216_v15 = vsub.f32 %v214_v13, %v215_v14 }
  0xfb   :  { %v217_v16 = vadd.f32 1e-05, %v216_v15  ;;  %v490_v15 = vld [vmem:[%s1233_s1 + $0x298] sm:$0xff] }
  0xfd   :  { %835 = vrsqrt.f32 %v217_v16  ;;  %v489_v16 = vld [vmem:[%s1233_s1 + $0x290] sm:$0xff] }
 0x10a   :  { %v836_v21 = vpop.eup %835 }
 0x10b   :  { %v219_v22 = vmul.f32 %v836_v21, %v197_v19  ;;  %v486_v19 = vld [vmem:[%s1233_s1 + $0x278] sm:$0xff]  ;;  %v485_v21 = vld [vmem:[%s1233_s1 + $0x270] sm:$0xff] }
 0x10d   :  { %v225_v24 = vrot.slane %v219_v22, %v1065_v20  ;;  %v220_v25 = vmul.f32 %v219_v22, %v206_v11  ;;  %v484_v22 = vld [vmem:[%s1233_s1 + $0x268] sm:$0xff] }
 0x10f   :  { %v221_v26 = vsub.f32 %v198_v23, %v220_v25  ;;  %v226_v27 = vmul.f32 %v225_v24, %v194_v61  ;;  %v483_v23 = vld [vmem:[%s1233_s1 + $0x260] sm:$0xff]  ;;  %v482_v24 = vld [vmem:[%s1233_s1 + $0x258] sm:$0xff]  ;;  %v481_v25 = vld [vmem:[%s1233_s1 + $0x250] sm:$0xff] }
 0x111   :  { %v230_v28 = vrot.slane %v221_v26, %v1065_v20  ;;  %v480_v26 = vld [vmem:[%s1233_s1 + $0x248] sm:$0xff] }
 0x113   :  { %v231_v29 = vadd.f32 %v230_v28, %v226_v27  ;;  %v479_v27 = vld [vmem:[%s1233_s1 + $0x240] sm:$0xff]  ;;  %v478_v28 = vld [vmem:[%s1233_s1 + $0x238] sm:$0xff] }
 0x115   :  { %v232_v30 = vmax.f32 %v231_v29, 0.0  ;;  %v477_v29 = vld [vmem:[%s1233_s1 + $0x230] sm:$0xff] }
 0x117   :  { %761 = vmatmul.mubr.f32.vlgmr.msra.gmra.mxu1 %v232_v30  ;;  %v476_v30 = vld [vmem:[%s1233_s1 + $0x228] sm:$0xff] }
 0x118   :  { %830 = vmatprep.mubr.msk.f32.mxu1 %vm848_vm0, %v847_v3  ;;  %799 = vmatpush3.msra.mxu1 %v490_v15 }
 0x119   :  { %800 = vmatprep.subr.mxu1 %v847_v3 }
 0x11a   :  { %801 = vmatpush3.msra.mxu1 %v489_v16 }
 0x11b   :  { %802 = vmatprep.subr.mxu1 %v847_v3 }
 0x11c   :  { %803 = vmatpush3.msra.mxu1 %v488_v17 }
 0x11d   :  { %804 = vmatprep.subr.mxu1 %v847_v3 }
 0x11e   :  { %805 = vmatpush3.msra.mxu1 %v487_v18 }
 0x11f   :  { %806 = vmatprep.subr.mxu1 %v847_v3 }
 0x120   :  { %807 = vmatpush3.msra.mxu1 %v486_v19  ;;  %v561_v19 = vld [vmem:[%s1235_s2 + $0x6] sm:$0x1] }
 0x121   :  { %808 = vmatprep.subr.mxu1 %v847_v3 }
 0x122   :  { %809 = vmatpush3.msra.mxu1 %v485_v21 }
 0x123   :  { %810 = vmatprep.subr.mxu1 %v847_v3 }
 0x124   :  { %811 = vmatpush3.msra.mxu1 %v484_v22 }
 0x125   :  { %812 = vmatprep.subr.mxu1 %v847_v3 }
 0x126   :  { %813 = vmatpush3.msra.mxu1 %v483_v23  ;;  %v562_v23 = vld [vmem:[%s1235_s2 + $0x7] sm:$0x1] }
 0x127   :  { %814 = vmatprep.subr.mxu1 %v847_v3 }
 0x128   :  { %815 = vmatpush3.msra.mxu1 %v482_v24 }
 0x129   :  { %816 = vmatprep.subr.mxu1 %v847_v3 }
 0x12a   :  { %817 = vmatpush3.msra.mxu1 %v481_v25 }
 0x12b   :  { %818 = vmatprep.subr.mxu1 %v847_v3 }
 0x12c   :  { %819 = vmatpush3.msra.mxu1 %v480_v26 }
 0x12d   :  { %820 = vmatprep.subr.mxu1 %v847_v3 }
 0x12e   :  { %821 = vmatpush3.msra.mxu1 %v479_v27 }
 0x12f   :  { %822 = vmatprep.subr.mxu1 %v847_v3 }
 0x130   :  { %823 = vmatpush3.msra.mxu1 %v478_v28 }
 0x131   :  { %824 = vmatprep.subr.mxu1 %v847_v3 }
 0x132   :  { %825 = vmatpush3.msra.mxu1 %v477_v29 }
 0x133   :  { %826 = vmatprep.subr.mxu1 %v847_v3 }
 0x134   :  { %827 = vmatpush3.msra.mxu1 %v476_v30  ;;  %v623_v30 = vld [vmem:[%s1235_s2 + $0x8] ss:$0 sm:$0xff] }
 0x135   :  { %828 = vmatprep.subr.mxu1 %v847_v3 }
 0x136   :  { %829 = vmatpush3.msra.mxu1 %v475_v31 }
 0x1d7   :  { %v315_v47 = vpop.f32.mrf.mxu1 }
 0x1d8   :  { %v321_v48 = vrot.slane %v315_v47, 4  ;;  %v328_v49 = vmul.f32 %v315_v47, %v315_v47 }
 0x1d9   :  { %v762_v50 = vpop.f32.mrf.mxu1 }
 0x1da   :  { %v322_v51 = vadd.f32 %v321_v48, %v315_v47  ;;  %v329_v52 = vrot.slane %v328_v49, 4 }
 0x1dc   :  { %v323_v53 = vrot.slane %v322_v51, 2  ;;  %v330_v54 = vadd.f32 %v329_v52, %v328_v49 }
 0x1de   :  { %v324_v55 = vadd.f32 %v323_v53, %v322_v51  ;;  %v331_v56 = vrot.slane %v330_v54, 2  ;;  %v440_v51 = vld [vmem:[%s1235_s2 + $0x4] sm:$0x1] }
 0x1e0   :  { %v325_v57 = vrot.slane %v324_v55, 1  ;;  %v332_v58 = vadd.f32 %v331_v56, %v330_v54  ;;  %v441_v54 = vld [vmem:[%s1235_s2 + $0x5] sm:$0x1] }
 0x1e2   :  { %v326_v59 = vadd.f32 %v325_v57, %v324_v55  ;;  %v333_v60 = vrot.slane %v332_v58, 1 }
 0x1e4   :  { %v327_v61 = vmul.f32 0.125, %v326_v59  ;;  %v334_v62 = vadd.f32 %v333_v60, %v332_v58 }
 0x1e6   :  { %v335_v63 = vmul.f32 0.125, %v334_v62  ;;  %v336_v0 = vmul.f32 %v327_v61, %v327_v61 }
 0x1e8   :  { %v337_v1 = vsub.f32 %v335_v63, %v336_v0 }
 0x1ea   :  { %v338_v2 = vadd.f32 1e-05, %v337_v1 }
 0x1ec   :  { %837 = vrsqrt.f32 %v338_v2 }
 0x1f9   :  { %v838_v5 = vpop.eup %837 }
 0x1fa   :  { %v340_v6 = vmul.f32 %v838_v5, %v319_v4 }
 0x1fc   :  { %v341_v8 = vmul.f32 %v340_v6, %v327_v61  ;;  %v346_v9 = vrot.slane %v340_v6, %v1065_v20 }
 0x1fe   :  { %v342_v10 = vsub.f32 %v320_v7, %v341_v8  ;;  %v347_v11 = vmul.f32 %v346_v9, %v315_v47 }
 0x200   :  { %v351_v12 = vrot.slane %v342_v10, %v1065_v20 }
 0x202   :  { %v352_v13 = vadd.f32 %v351_v12, %v347_v11 }
 0x204   :  { %v353_v14 = vmax.f32 %v352_v13, 0.0 }
 0x206   :  { %796 = vmatmul.mubr.f32.vlgmr.msra.gmra.mxu0 %v353_v14 }
 0x2c6   :  { %v436_v32 = vpop.f32.mrf.mxu0 }
 0x2c7   :  { %v442_v33 = vrot.slane %v436_v32, 4  ;;  %v449_v34 = vmul.f32 %v436_v32, %v436_v32 }
 0x2c8   :  { %v797_v35 = vpop.f32.mrf.mxu0 }
 0x2c9   :  { %v443_v36 = vadd.f32 %v442_v33, %v436_v32  ;;  %v450_v37 = vrot.slane %v449_v34, 4  ;;  %v624_v33 = vld [vmem:[%s1235_s2 + $0x9] ss:$0 sm:$0xff] }
 0x2cb   :  { %v444_v38 = vrot.slane %v443_v36, 2  ;;  %v451_v39 = vadd.f32 %v450_v37, %v449_v34 }
 0x2cd   :  { %v445_v40 = vadd.f32 %v444_v38, %v443_v36  ;;  %v452_v41 = vrot.slane %v451_v39, 2 }
 0x2cf   :  { %v446_v42 = vrot.slane %v445_v40, 1  ;;  %v453_v43 = vadd.f32 %v452_v41, %v451_v39 }
 0x2d1   :  { %v447_v44 = vadd.f32 %v446_v42, %v445_v40  ;;  %v454_v45 = vrot.slane %v453_v43, 1 }
 0x2d3   :  { %v448_v46 = vmul.f32 0.125, %v447_v44  ;;  %v455_v47 = vadd.f32 %v454_v45, %v453_v43 }
 0x2d5   :  { %v456_v48 = vmul.f32 0.125, %v455_v47  ;;  %v457_v49 = vmul.f32 %v448_v46, %v448_v46 }
 0x2d7   :  { %v458_v3 = vsub.f32 %v456_v48, %v457_v49 }
 0x2d9   :  { %v459_v50 = vadd.f32 1e-05, %v458_v3 }
 0x2db   :  { %839 = vrsqrt.f32 %v459_v50 }
 0x2e8   :  { %v840_v52 = vpop.eup %839 }
 0x2e9   :  { %v461_v53 = vmul.f32 %v840_v52, %v440_v51 }
 0x2eb   :  { %v462_v55 = vmul.f32 %v461_v53, %v448_v46  ;;  %v467_v56 = vrot.slane %v461_v53, %v1065_v20 }
 0x2ed   :  { %v463_v57 = vsub.f32 %v441_v54, %v462_v55  ;;  %v468_v58 = vmul.f32 %v467_v56, %v436_v32 }
 0x2ef   :  { %v472_v59 = vrot.slane %v463_v57, %v1065_v20 }
 0x2f1   :  { %v473_v60 = vadd.f32 %v472_v59, %v468_v58 }
 0x2f3   :  { %v474_v61 = vmax.f32 %v473_v60, 0.0 }
 0x2f5   :  { %831 = vmatmul.mubr.f32.vlgmr.msra.gmra.mxu1 %v474_v61 }
 0x3b5   :  { %v557_v62 = vpop.f32.mrf.mxu1 }
 0x3b6   :  { %v563_v63 = vrot.slane %v557_v62, 4  ;;  %v570_v0 = vmul.f32 %v557_v62, %v557_v62 }
 0x3b7   :  { %v832_v1 = vpop.f32.mrf.mxu1 }
 0x3b8   :  { %v564_v2 = vadd.f32 %v563_v63, %v557_v62  ;;  %v571_v4 = vrot.slane %v570_v0, 4 }
 0x3ba   :  { %v565_v5 = vrot.slane %v564_v2, 2  ;;  %v572_v6 = vadd.f32 %v571_v4, %v570_v0 }
 0x3bc   :  { %v566_v7 = vadd.f32 %v565_v5, %v564_v2  ;;  %v573_v8 = vrot.slane %v572_v6, 2 }
 0x3be   :  { %v567_v9 = vrot.slane %v566_v7, 1  ;;  %v574_v10 = vadd.f32 %v573_v8, %v572_v6 }
 0x3c0   :  { %v568_v11 = vadd.f32 %v567_v9, %v566_v7  ;;  %v575_v12 = vrot.slane %v574_v10, 1 }
 0x3c2   :  { %v569_v13 = vmul.f32 0.125, %v568_v11  ;;  %v576_v14 = vadd.f32 %v575_v12, %v574_v10 }
 0x3c4   :  { %v577_v15 = vmul.f32 0.125, %v576_v14  ;;  %v578_v16 = vmul.f32 %v569_v13, %v569_v13 }
 0x3c6   :  { %v579_v17 = vsub.f32 %v577_v15, %v578_v16 }
 0x3c8   :  { %v580_v18 = vadd.f32 1e-05, %v579_v17 }
 0x3ca   :  { %841 = vrsqrt.f32 %v580_v18 }
 0x3d7   :  { %v842_v21 = vpop.eup %841 }
 0x3d8   :  { %v582_v22 = vmul.f32 %v842_v21, %v561_v19 }
 0x3da   :  { %v583_v24 = vmul.f32 %v582_v22, %v569_v13  ;;  %v588_v25 = vrot.slane %v582_v22, %v1065_v20 }
 0x3dc   :  { %v584_v26 = vsub.f32 %v562_v23, %v583_v24  ;;  %v589_v27 = vmul.f32 %v588_v25, %v557_v62 }
 0x3de   :  { %v593_v28 = vrot.slane %v584_v26, %v1065_v20 }
 0x3e0   :  { %v594_v29 = vadd.f32 %v593_v28, %v589_v27 }
 0x3e2   :  { %v595_v31 = vmax.f32 %v594_v29, 0.0 }
 0x3e4   :  { %v602_v32 = vmul.f32 %v623_v30, %v595_v31 }
 0x3e6   :  { %603 = vadd.xlane.f32.xlu0 %v602_v32 }
 0x46f   :  { %v604_v34 = vpop.xlane.xlu0 %603 }
 0x470   :  { %v609_v35 = vadd.f32 %v624_v33, %v604_v34 }
 0x472   :  { %v625_v36 = vmul.f32 -1.442695, %v609_v35 }
 0x474   :  { %843 = vpow2.f32 %v625_v36 }
 0x481   :  { %v844_v37 = vpop.eup %843 }
 0x482   :  { %v613_v38 = vadd.f32 1.0, %v844_v37 }
 0x484   :  { %845 = vrcp.f32 %v613_v38 }
 0x491   :  { %v846_v20 = vpop.eup %845 }
 0x492   :  { %617 = vst.msk [vmem:[%s1236_s3] sm:$0xff] %vm616_vm2, %v846_v20 }

</bundles_post_ra>
